<compile_context>
chip_gen: v5e
topology: v5e:2x2
jax: 0.10.0
libtpu: 0.0.40
codegen_flags: <defaults>
</compile_context>

<pallas_src>
import functools

import jax
import jax.numpy as jnp
from jax.experimental import pallas as pl
from jax.experimental.pallas import tpu as pltpu

_LANE = 128
_SUB = 8
_ROW_ALIGN = 16          # rows/tile multiples of 16 -> safe for bf16 (16,128) tiling
_MAX_TILE_ROWS = 2048    # ~9 MiB double-buffered per-step footprint
_MIN_TILE_ROWS = 256


# ----------------------------------------------------------------------------
# Lane-dense layout helpers (wrapper side)
# ----------------------------------------------------------------------------
def _plan_rows(hw):
    """Return (rows, tile_rows) for a flattened spatial extent of `hw` elements.

    rows = smallest multiple of _ROW_ALIGN covering ceil(hw / 128).
    tile_rows = largest divisor of rows that is a multiple of _ROW_ALIGN and
    <= _MAX_TILE_ROWS, so no extra HBM padding is introduced.  Only a pathological
    factorization falls back to padding rows up to a tile multiple.
    """
    rows = -(-hw // _LANE)                                   # ceil(hw / 128)
    rows = max(_ROW_ALIGN, -(-rows // _ROW_ALIGN) * _ROW_ALIGN)
    if rows <= _MAX_TILE_ROWS:
        return rows, rows
    units = rows // _ROW_ALIGN
    for k in range(-(-rows // _MAX_TILE_ROWS), units + 1):
        if units % k == 0:                                   # first divisor -> largest tile
            tile = rows // k
            if tile >= _MIN_TILE_ROWS:
                return rows, tile
            break
    tile = _MAX_TILE_ROWS                                    # rare fallback: pad to tile multiple
    return -(-rows // tile) * tile, tile


def _flow_lane_dense(x, rows):
    """(B, 2, H, W) -> (B, 2, rows, 128), zero padded (dtype preserved)."""
    B, C, H, W = x.shape
    hw = H * W
    x = x.reshape(B, C, hw)
    pad = rows * _LANE - hw
    if pad:
        x = jnp.pad(x, ((0, 0), (0, 0), (0, pad)))
    return x.reshape(B, C, rows, _LANE)


def _map_lane_dense(x, rows):
    """(B, H, W) -> (B, rows, 128), zero padded (padding -> mask 0)."""
    B, H, W = x.shape
    hw = H * W
    x = x.reshape(B, hw)
    pad = rows * _LANE - hw
    if pad:
        x = jnp.pad(x, ((0, 0), (0, pad)))
    return x.reshape(B, rows, _LANE)


# ----------------------------------------------------------------------------
# Fused mask + masked-L1 partial-sum kernel (no scratch, both grid axes parallel)
# ----------------------------------------------------------------------------
def _masked_l1_kernel(pred_ref, gt_ref, valid_ref, num_ref, den_ref, *,
                      max_flow_sq, compare_mag):
    p0 = pred_ref[0, 0].astype(jnp.float32)
    p1 = pred_ref[0, 1].astype(jnp.float32)
    g0 = gt_ref[0, 0].astype(jnp.float32)
    g1 = gt_ref[0, 1].astype(jnp.float32)
    val = valid_ref[0].astype(jnp.float32)        # bf16 0/1 map -> f32

    if compare_mag:
        # mask = (valid >= 0.5) & (|gt|^2 < max_flow^2) -- squared compare, no sqrt.
        # gt doubles as the magnitude source (same-resolution scale): no extra loads.
        mask = ((val > 0.0) & (g0 * g0 + g1 * g1 < max_flow_sq)).astype(jnp.float32)
    else:
        mask = val                                # mask already precomputed (0/1)

    num = mask * (jnp.abs(p0 - g0) + jnp.abs(p1 - g1))

    tr = num.shape[0]
    # Fold (tile_rows, 128) -> (8, 128) partials; the final scalar reduce happens in JAX.
    num_ref[0, 0] = num.reshape(tr // _SUB, _SUB, _LANE).sum(axis=0)
    den_ref[0, 0] = mask.reshape(tr // _SUB, _SUB, _LANE).sum(axis=0)


def masked_l1_sums(pred, gt_s, valid01, max_flow, compare_mag):
    """Returns (sum(mask * |pred - gt_s|_1), sum(mask)) over the whole batch.

    valid01 is a (B, H, W) 0/1 map (any float dtype).  If compare_mag, the kernel
    additionally requires ||gt_s||^2 < max_flow^2 (fully fused mask, same-res scale);
    otherwise valid01 is taken as the final mask (precomputed / nearest-gathered).
    """
    B, C, H, W = pred.shape
    assert C == 2 and gt_s.shape == pred.shape and valid01.shape == (B, H, W)

    rows, tile = _plan_rows(H * W)
    n_tiles = rows // tile

    pred_ld = _flow_lane_dense(pred, rows)
    gt_ld = _flow_lane_dense(gt_s, rows)
    val_ld = _map_lane_dense(valid01.astype(jnp.bfloat16), rows)   # 2 B/px mask stream

    flow_spec = pl.BlockSpec((1, 2, tile, _LANE), lambda b, t: (b, 0, t, 0))
    part_spec = pl.BlockSpec((1, 1, _SUB, _LANE), lambda b, t: (b, t, 0, 0))

    num_p, den_p = pl.pallas_call(
        functools.partial(
            _masked_l1_kernel,
            max_flow_sq=float(max_flow) * float(max_flow),
            compare_mag=compare_mag,
        ),
        out_shape=(
            jax.ShapeDtypeStruct((B, n_tiles, _SUB, _LANE), jnp.float32),
            jax.ShapeDtypeStruct((B, n_tiles, _SUB, _LANE), jnp.float32),
        ),
        grid=(B, n_tiles),
        in_specs=[
            flow_spec,
            flow_spec,
            pl.BlockSpec((1, tile, _LANE), lambda b, t: (b, t, 0)),
        ],
        out_specs=(part_spec, part_spec),
        compiler_params=pltpu.CompilerParams(
            dimension_semantics=("parallel", "parallel"),
        ),
    )(pred_ld, gt_ld, val_ld)
    return jnp.sum(num_p), jnp.sum(den_p)


# ----------------------------------------------------------------------------
# Interpolation glue (plain JAX) matching PyTorch F.interpolate semantics
# ----------------------------------------------------------------------------
def bilinear_resize_nchw(x, out_h, out_w):
    """Bilinear resize, align_corners=False, antialias=False (PyTorch semantics)."""
    B, C, H, W = x.shape

    def coords(out_size, in_size):
        i = jnp.arange(out_size, dtype=jnp.float32)
        src = (i + 0.5) * (in_size / out_size) - 0.5
        src = jnp.clip(src, 0.0, in_size - 1)
        lo = jnp.floor(src).astype(jnp.int32)
        hi = jnp.minimum(lo + 1, in_size - 1)
        frac = src - lo.astype(jnp.float32)
        return lo, hi, frac

    h_lo, h_hi, h_f = coords(out_h, H)
    w_lo, w_hi, w_f = coords(out_w, W)

    x_lo = x[:, :, h_lo, :]
    x_hi = x[:, :, h_hi, :]
    xh = x_lo * (1.0 - h_f)[None, None, :, None] + x_hi * h_f[None, None, :, None]
    y_lo = xh[:, :, :, w_lo]
    y_hi = xh[:, :, :, w_hi]
    return y_lo * (1.0 - w_f) + y_hi * w_f


def _nearest_indices(out_size, in_size):
    """PyTorch mode='nearest': src_idx = floor(dst_idx * in / out)."""
    return jnp.floor(jnp.arange(out_size) * (in_size / out_size)).astype(jnp.int32)


def nearest_resize_mask(mask, out_h, out_w):
    B, H, W = mask.shape
    idx_h = _nearest_indices(out_h, H)
    idx_w = _nearest_indices(out_w, W)
    return mask[:, idx_h[:, None], idx_w[None, :]]


# ----------------------------------------------------------------------------
# SequenceLoss module (forward only; gamma is unused in forward, as in PyTorch)
# ----------------------------------------------------------------------------
class SequenceLoss:
    def __init__(self, gamma=0.8, max_flow=400.0, weights=None):
        self.gamma = gamma
        self.max_flow = max_flow
        self.weights = weights if weights is not None else [0.32, 0.08, 0.02, 0.01, 0.005]

    def __call__(self, flow_preds, flow_gt, valid):
        if not isinstance(flow_preds, (list, tuple)):
            flow_preds = [flow_preds]

        H, W = flow_gt.shape[-2:]
        any_coarse = any(p.shape[-2:] != (H, W) for p in flow_preds)

        vmask_full = None
        if any_coarse:
            # Full-res validity mask computed ONCE per call as a 2-byte bf16 0/1 map; the
            # coarse scales nearest-gather this map instead of gathering full-res flow.
            gt32 = flow_gt.astype(jnp.float32)
            magsq = jnp.sum(gt32 * gt32, axis=1)
            vmask_full = ((valid >= 0.5) & (magsq < self.max_flow ** 2)).astype(jnp.bfloat16)

        total_loss = jnp.float32(0.0)
        for i, flow_pred in enumerate(flow_preds):
            weight = self.weights[i] if i < len(self.weights) else self.weights[-1]
            if flow_pred.shape[-2:] != (H, W):
                Hs, Ws = flow_pred.shape[-2:]
                scale_factor = Ws / W
                gt_s = bilinear_resize_nchw(flow_gt, Hs, Ws) * scale_factor
                idx_h = _nearest_indices(Hs, H)
                idx_w = _nearest_indices(Ws, W)
                vmask_s = vmask_full[:, idx_h[:, None], idx_w[None, :]]   # single fused gather
                num, den = masked_l1_sums(flow_pred, gt_s, vmask_s, self.max_flow,
                                          compare_mag=False)
            elif any_coarse:
                # Mask already materialized for the coarse scales -> reuse it directly.
                num, den = masked_l1_sums(flow_pred, flow_gt, vmask_full, self.max_flow,
                                          compare_mag=False)
            else:
                # Single full-resolution scale: fully fused mask (mag test in-kernel),
                # only the 2-byte thresholded valid map travels to HBM.
                v01 = (valid >= 0.5).astype(jnp.bfloat16)
                num, den = masked_l1_sums(flow_pred, flow_gt, v01, self.max_flow,
                                          compare_mag=True)
            total_loss = total_loss + weight * (num / (den + 1e-8))
        return total_loss


# ----------------------------------------------------------------------------
# Pure-JAX reference (for sanity checking the kernels)
# ----------------------------------------------------------------------------
def reference_loss(flow_preds, flow_gt, valid, max_flow=400.0, weights=None):
    weights = weights if weights is not None else [0.32, 0.08, 0.02, 0.01, 0.005]
    if not isinstance(flow_preds, (list, tuple)):
        flow_preds = [flow_preds]
    mag = jnp.sqrt(jnp.sum(flow_gt ** 2, axis=1))
    v = ((valid >= 0.5) & (mag < max_flow)).astype(jnp.float32)
    total = jnp.float32(0.0)
    for i, pred in enumerate(flow_preds):
        w = weights[i] if i < len(weights) else weights[-1]
        if pred.shape[-2:] != flow_gt.shape[-2:]:
            scale = pred.shape[-1] / flow_gt.shape[-1]
            gt_s = bilinear_resize_nchw(flow_gt, pred.shape[-2], pred.shape[-1]) * scale
            v_s = (nearest_resize_mask(v, pred.shape[-2], pred.shape[-1]) > 0.5).astype(jnp.float32)
        else:
            gt_s, v_s = flow_gt, v
        diff = jnp.abs(pred - gt_s)
        ve = v_s[:, None, :, :]
        total = total + w * ((ve * diff).sum() / (ve.sum() + 1e-8))
    return total


# ----------------------------------------------------------------------------
if __name__ == "__main__":
    key = jax.random.PRNGKey(0)
    B, H, W = 2, 16, 16

    k1, k2, k3, k4, k5 = jax.random.split(key, 5)
    flow_gt = 5.0 * jax.random.normal(k1, (B, 2, H, W), dtype=jnp.float32)
    valid = jax.random.uniform(k2, (B, H, W), dtype=jnp.float32)

    # Multi-scale predictions: 1/4, 1/2, full resolution.
    flow_preds = [
        jax.random.normal(k3, (B, 2, H // 4, W // 4), dtype=jnp.float32),
        jax.random.normal(k4, (B, 2, H // 2, W // 2), dtype=jnp.float32),
        jax.random.normal(k5, (B, 2, H, W), dtype=jnp.float32),
    ]

    loss_fn = SequenceLoss()

    # Multi-scale (list) path: precomputed-mask kernel mode.
    loss = loss_fn(flow_preds, flow_gt, valid)
    loss = jax.block_until_ready(loss)
    ref = reference_loss(flow_preds, flow_gt, valid)
    assert jnp.allclose(loss, ref, rtol=1e-5, atol=1e-5), (loss, ref)

    # Single-tensor path (final scale only): fully fused in-kernel mask mode.
    loss_single = loss_fn(flow_preds[-1], flow_gt, valid)
    loss_single = jax.block_until_ready(loss_single)
    ref_single = reference_loss(flow_preds[-1], flow_gt, valid)
    assert jnp.allclose(loss_single, ref_single, rtol=1e-5, atol=1e-5), (loss_single, ref_single)

    print("KERNEL_OK")
</pallas_src>

<mosaic_0001>
module attributes {stable_mosaic.version = 11 : i64} {
  func.func @_masked_l1_kernel(%arg0: i32, %arg1: i32, %arg2: memref<1x2x16x128xf32, #tpu.memory_space<vmem>>, %arg3: memref<1x2x16x128xf32, #tpu.memory_space<vmem>>, %arg4: memref<1x16x128xbf16, #tpu.memory_space<vmem>>, %arg5: memref<1x1x8x128xf32, #tpu.memory_space<vmem>>, %arg6: memref<1x1x8x128xf32, #tpu.memory_space<vmem>>) attributes {dimension_semantics = [#tpu.dimension_semantics<parallel>, #tpu.dimension_semantics<parallel>], iteration_bounds = array<i64: 2, 1>, scalar_prefetch = 0 : i64, scratch_operands = 0 : i64, tpu.core_type = #tpu.core_type<tc>, window_params = [{transform_indices = @transform_0, window_bounds = array<i64: 1, 2, 16, 128>}, {transform_indices = @transform_1, window_bounds = array<i64: 1, 2, 16, 128>}, {transform_indices = @transform_2, window_bounds = array<i64: 1, 16, 128>}, {transform_indices = @transform_3, window_bounds = array<i64: 1, 1, 8, 128>}, {transform_indices = @transform_4, window_bounds = array<i64: 1, 1, 8, 128>}]} {
    %c0 = arith.constant 0 : index
    %c0_0 = arith.constant 0 : index
    %c0_1 = arith.constant 0 : index
    %c0_2 = arith.constant 0 : index
    %0 = vector.load %arg2[%c0, %c0_0, %c0_1, %c0_2] : memref<1x2x16x128xf32, #tpu.memory_space<vmem>>, vector<1x1x16x128xf32>
    %1 = vector.shape_cast %0 : vector<1x1x16x128xf32> to vector<16x128xf32>
    %c0_3 = arith.constant 0 : index
    %c1 = arith.constant 1 : index
    %c0_4 = arith.constant 0 : index
    %c0_5 = arith.constant 0 : index
    %2 = vector.load %arg2[%c0_3, %c1, %c0_4, %c0_5] : memref<1x2x16x128xf32, #tpu.memory_space<vmem>>, vector<1x1x16x128xf32>
    %3 = vector.shape_cast %2 : vector<1x1x16x128xf32> to vector<16x128xf32>
    %c0_6 = arith.constant 0 : index
    %c0_7 = arith.constant 0 : index
    %c0_8 = arith.constant 0 : index
    %c0_9 = arith.constant 0 : index
    %4 = vector.load %arg3[%c0_6, %c0_7, %c0_8, %c0_9] : memref<1x2x16x128xf32, #tpu.memory_space<vmem>>, vector<1x1x16x128xf32>
    %5 = vector.shape_cast %4 : vector<1x1x16x128xf32> to vector<16x128xf32>
    %c0_10 = arith.constant 0 : index
    %c1_11 = arith.constant 1 : index
    %c0_12 = arith.constant 0 : index
    %c0_13 = arith.constant 0 : index
    %6 = vector.load %arg3[%c0_10, %c1_11, %c0_12, %c0_13] : memref<1x2x16x128xf32, #tpu.memory_space<vmem>>, vector<1x1x16x128xf32>
    %7 = vector.shape_cast %6 : vector<1x1x16x128xf32> to vector<16x128xf32>
    %c0_14 = arith.constant 0 : index
    %c0_15 = arith.constant 0 : index
    %c0_16 = arith.constant 0 : index
    %8 = vector.load %arg4[%c0_14, %c0_15, %c0_16] : memref<1x16x128xbf16, #tpu.memory_space<vmem>>, vector<1x16x128xbf16>
    %9 = vector.shape_cast %8 : vector<1x16x128xbf16> to vector<16x128xbf16>
    %10 = arith.extf %9 : vector<16x128xbf16> to vector<16x128xf32>
    %11 = arith.subf %1, %5 : vector<16x128xf32>
    %12 = math.absf %11 : vector<16x128xf32>
    %13 = arith.subf %3, %7 : vector<16x128xf32>
    %14 = math.absf %13 : vector<16x128xf32>
    %15 = arith.addf %12, %14 : vector<16x128xf32>
    %16 = arith.mulf %10, %15 : vector<16x128xf32>
    %17 = vector.shape_cast %16 : vector<16x128xf32> to vector<2x8x128xf32>
    %cst = arith.constant dense<0.000000e+00> : vector<8x128xf32>
    %18 = vector.multi_reduction <add>, %17, %cst [0] : vector<2x8x128xf32> to vector<8x128xf32>
    %c0_17 = arith.constant 0 : index
    %c0_18 = arith.constant 0 : index
    %c0_19 = arith.constant 0 : index
    %c0_20 = arith.constant 0 : index
    %19 = vector.load %arg5[%c0_17, %c0_18, %c0_19, %c0_20] : memref<1x1x8x128xf32, #tpu.memory_space<vmem>>, vector<1x1x8x128xf32>
    %20 = vector.shape_cast %19 : vector<1x1x8x128xf32> to vector<8x128xf32>
    %21 = vector.shape_cast %18 : vector<8x128xf32> to vector<1x1x8x128xf32>
    tpu.vector_store %arg5[%c0_17, %c0_18, %c0_19, %c0_20], %21 {strides = array<i32>} : memref<1x1x8x128xf32, #tpu.memory_space<vmem>>, vector<1x1x8x128xf32>,
    %22 = vector.shape_cast %10 : vector<16x128xf32> to vector<2x8x128xf32>
    %cst_21 = arith.constant dense<0.000000e+00> : vector<8x128xf32>
    %23 = vector.multi_reduction <add>, %22, %cst_21 [0] : vector<2x8x128xf32> to vector<8x128xf32>
    %c0_22 = arith.constant 0 : index
    %c0_23 = arith.constant 0 : index
    %c0_24 = arith.constant 0 : index
    %c0_25 = arith.constant 0 : index
    %24 = vector.load %arg6[%c0_22, %c0_23, %c0_24, %c0_25] : memref<1x1x8x128xf32, #tpu.memory_space<vmem>>, vector<1x1x8x128xf32>
    %25 = vector.shape_cast %24 : vector<1x1x8x128xf32> to vector<8x128xf32>
    %26 = vector.shape_cast %23 : vector<8x128xf32> to vector<1x1x8x128xf32>
    tpu.vector_store %arg6[%c0_22, %c0_23, %c0_24, %c0_25], %26 {strides = array<i32>} : memref<1x1x8x128xf32, #tpu.memory_space<vmem>>, vector<1x1x8x128xf32>,
    return
  }
  func.func @transform_0(%arg0: i32, %arg1: i32) -> (i32, i32, i32, i32) {
    %c0_i32 = arith.constant 0 : i32
    %c0_i32_0 = arith.constant 0 : i32
    %c0_i32_1 = arith.constant 0 : i32
    return %arg0, %c0_i32, %arg1, %c0_i32_0 : i32, i32, i32, i32
  }
  func.func @transform_1(%arg0: i32, %arg1: i32) -> (i32, i32, i32, i32) {
    %c0_i32 = arith.constant 0 : i32
    %c0_i32_0 = arith.constant 0 : i32
    %c0_i32_1 = arith.constant 0 : i32
    return %arg0, %c0_i32, %arg1, %c0_i32_0 : i32, i32, i32, i32
  }
  func.func @transform_2(%arg0: i32, %arg1: i32) -> (i32, i32, i32) {
    %c0_i32 = arith.constant 0 : i32
    %c0_i32_0 = arith.constant 0 : i32
    return %arg0, %arg1, %c0_i32 : i32, i32, i32
  }
  func.func @transform_3(%arg0: i32, %arg1: i32) -> (i32, i32, i32, i32) {
    %c0_i32 = arith.constant 0 : i32
    %c0_i32_0 = arith.constant 0 : i32
    %c0_i32_1 = arith.constant 0 : i32
    return %arg0, %arg1, %c0_i32, %c0_i32_0 : i32, i32, i32, i32
  }
  func.func @transform_4(%arg0: i32, %arg1: i32) -> (i32, i32, i32, i32) {
    %c0_i32 = arith.constant 0 : i32
    %c0_i32_0 = arith.constant 0 : i32
    %c0_i32_1 = arith.constant 0 : i32
    return %arg0, %arg1, %c0_i32, %c0_i32_0 : i32, i32, i32, i32
  }
}

</mosaic_0001>

<bundles_post_ra>
// kernel: tpu_custom_call.1
= control target key start
LH: loop header
LB: loop body
LE: loop exit
PB: predicated region body
PF: predicated region fallthrough
CT: control target
= control target key end

     0   :  { %s1120_s0 = inlined_call_operand.hbm [shape: f32[2,2,16,128], index: 0, kind: input, shape index: {}]   ;;  %s1121_s1 = inlined_call_operand.hbm [shape: f32[2,2,16,128], index: 1, kind: input, shape index: {}]   ;;  %s1122_s2 = inlined_call_operand.hbm [shape: bf16[2,16,128], index: 2, kind: input, shape index: {}]   ;;  %s1123_s3 = inlined_call_operand.hbm [shape: f32[2,1,8,128], index: 3, kind: output, shape index: {0}]   ;;  %s1124_s4 = inlined_call_operand.hbm [shape: f32[2,1,8,128], index: 4, kind: output, shape index: {1}]  }
   0x1   :  { %1133 = sst [smem:[#allocation22_spill]] %s1121_s1 }
   0x2   :  { %10 = vsyncpa [#allocation3], 0 }
   0x3   :  { %12 = vsyncpa [#allocation3 + $0x1], 0 }
   0x4   :  { %13 = vsyncpa [#allocation6], 0 }
   0x5   :  { %15 = vsyncpa [#allocation6 + $0x1], 0 }
   0x6   :  { %16 = vsyncpa [#allocation4], 0 }
   0x7   :  { %18 = vsyncpa [#allocation4 + $0x1], 0 }
   0x8   :  { %19 = vsyncpa [#allocation10], 0 }
   0x9   :  { %21 = vsyncpa [#allocation10 + $0x1], 0  ;;  %s929_s15 = smov 0   ;;  %s931_s16 = smov 0  }
   0xa   :  { %s933_s17 = smov 0   ;;  %s935_s18 = smov 0  }
   0xb   :  { %s937_s19 = smov 0   ;;  %s939_s20 = smov 0  }
   0xc LB: > { %1134 = sst [smem:[#allocation15_spill]] %s878_s15  ;;  %s960_s21 = sadd.s32 4294967295, %s898_s20   ;;  %s898_s20 = sphi %s939_s20, %s27_s20   ;;  %s894_s19 = sphi %s937_s19, %s1158_s19   ;;  %s890_s18 = sphi %s935_s18, %s1157_s18   ;;  %s886_s17 = sphi %s933_s17, %s1153_s17   ;;  %s882_s16 = sphi %s931_s16, %s1156_s16   ;;  %s878_s15 = sphi %s929_s15, %s1155_s15  }
   0xd   : > { %1135 = sst [smem:[#allocation16_spill]] %s886_s17  ;;  %s574_s22 = sadd.s32 4294967294, %s898_s20  }
   0xe   : > { %1136 = sst [smem:[#allocation17_spill]] %s898_s20  ;;  %s39_s23 = sadd.s32 1, %s894_s19 }
   0xf   : > { %s48_s24 = sadd.s32 1, %s886_s17  ;;  %p41_p0 = scmp.ge.s32.totalorder %s39_s23, 2 }
  0x10   : > { %p55_p1 = scmp.ne.s32.totalorder %s886_s17, %s882_s16  ;;  %p56_p2 = scmp.eq.s32.totalorder %s898_s20, 0 }
  0x11   : > { %p61_p3 = scmp.ne.s32.totalorder %s882_s16, %s878_s15  ;;  %s1160_s23 = smov (%p41_p0, %s39_s23), 0 }
  0x12   : > { %1137 = sst [smem:[#allocation18_spill]] %s1160_s23  ;;  %p972_p4 = por %p56_p2, %p55_p1 }
  0x13   : > { %p62_p5 = scmp.eq.s32.totalorder %s960_s21, 0  ;;  %s43_s26 = ssub.s32 %s894_s19, %s1160_s23 }
  0x14   : > { %p143_p6 = scmp.eq.s32.totalorder %s960_s21, 1  ;;  %p46_p7 = scmp.eq.s32.totalorder %s43_s26, 0 }
  0x15   : > { %p980_p8 = por %p62_p5, %p61_p3  ;;  %p149_p10 = scmp.eq.s32.totalorder %s574_s22, 1 }
  0x16   : > { %p984_p9 = por %p143_p6, %p55_p1  ;;  %p576_p12 = scmp.ge.s32.totalorder %s898_s20, 2 }
  0x17   : > { %s989_s29 = scalar_select %p46_p7, %s886_s17, %s48_s24  }
  0x18   : > { %s1140_s28 = scalar_select %p984_p9, 1, 0 }
  0x19   : > { %1142 = sst [smem:[#allocation20_spill]] %s989_s29  ;;  %p991_p11 = por %p149_p10, %p61_p3 }
  0x1a   : > { %1141 = sst [smem:[#allocation19_spill]] %s1140_s28  ;;  %p636_p13 = scmp.lt.s32.totalorder %s898_s20, 2 }
  0x1b   : > { %s1143_s30 = scalar_select %p991_p11, 1, 0 }
  0x1c   : > { %s998_s5 = sand.u32 1, %s886_s17   ;;  %s602_s7 = sshll.u32 %s894_s19, 5 }
  0x1d   : > { %1144 = sst [smem:[#allocation21_spill]] %s1143_s30  ;;  %s577_s6 = sshll.u32 %s998_s5, 5 }
  0x1e   : > { %p1004_p0 = pnand %p636_p13, %p972_p4  ;;  %s221_s9 = sand.u32 1, %s898_s20  }
  0x1f   : > { %s1146_s1 = sld [smem:[#allocation22_spill]]  ;;  %s225_s14 = scalar_lea.vmem [#allocation5], %s577_s6 }
  0x20   : > { %s235_s22 = sshll.u32 %s225_s14, 4  ;;  %s1012_s24 = scalar_lea.sflag [#allocation6], %s221_s9  ;;  %s236_s22 = int_to_ptr.vmem [resolvable:$true] %s235_s22 }
  0x21   : > { %s900_s25 = smov 128   ;;  %s901_s26 = smov 8  }
  0x22   : > { %p586_p1 = scmp.ge.s32.totalorder %s898_s20, 1  ;;  %p267_p2 = scmp.lt.s32.totalorder %s898_s20, 3 }
  0x23   : > { %s208_s14 = scalar_lea.hbm %s1120_s0, %s602_s7  ;;  %s201_s23 = scalar_lea.vmem [#allocation2], %s577_s6 }
  0x24   : > { %p1019_p3 = pnand %p586_p1, %p267_p2  ;;  %s211_s9 = sshll.u32 %s201_s23, 4  ;;  %s212_s9 = int_to_ptr.vmem [resolvable:$true] %s211_s9 }
  0x25   : > { %s232_s12 = scalar_lea.hbm %s1146_s1, %s602_s7  ;;  %s209_s1 = sshll.u32 %s208_s14, 4  ;;  %s210_s1 = int_to_ptr.hbm [resolvable:$true] %s209_s1 }
  0x26   : > { %s233_s13 = sshll.u32 %s232_s12, 4  ;;  %s198_s29 = scalar_lea.sflag [#allocation3], %s998_s5  ;;  %s234_s13 = int_to_ptr.hbm [resolvable:$true] %s233_s13 }
  0x27   : > { %625 = dma.hbm_to_vmem [thread:$0]  (!%p1004_p0), %s234_s13, 512, %s236_s22, %s1012_s24, %s900_s25, %s900_s25, %s901_s26  }
  0x28   : > { %622 = dma.hbm_to_vmem [thread:$0]  (!%p1004_p0), %s210_s1, 512, %s212_s9, %s198_s29, %s900_s25, %s900_s25, %s901_s26  }
  0x29   : > { %s583_s13 = sshll.u32 %s998_s5, 3  ;;  %s604_s22 = sshll.u32 %s894_s19, 3 }
  0x2a   : > { %s256_s30 = scalar_lea.hbm %s1122_s2, %s604_s22  ;;  %s249_s28 = scalar_lea.vmem [#allocation7], %s583_s13 }
  0x2b   : > { %s257_s15 = sshll.u32 %s256_s30, 4  ;;  %s259_s11 = sshll.u32 %s249_s28, 4  ;;  %s258_s15 = int_to_ptr.hbm [resolvable:$true] %s257_s15  ;;  %s260_s11 = int_to_ptr.vmem [resolvable:$true] %s259_s11 }
  0x2c   : > { %s902_s6 = smov 64   ;;  %s903_s7 = smov 4  }
  0x2d   : > { %628 = dma.hbm_to_vmem [thread:$0]  (!%p1004_p0), %s258_s15, 128, %s260_s11, %s1012_s24, %s902_s6, %s902_s6, %s903_s7  }
  0x2e   : > { %271 = sbr.rel (%p1019_p3) target bundleno = 86 (0x56), region = 32  ;;  %s1040_s1 = sand.u32 (!%p1019_p3), 1, %s882_s16  }
  0x2f   : > { %s587_s17 = sshll.u32 (!%p1019_p3), %s1040_s1, 5  ;;  %s274_s20 = scalar_lea.sflag (!%p1019_p3), [#allocation3], %s1040_s1 }
  0x30   : > { %s277_s23 = scalar_lea.vmem (!%p1019_p3), [#allocation2], %s587_s17 }
  0x33   : > { %861 = dma.done.wait (%p980_p8), %s274_s20, 512  }
  0x34   : > { %863 = vsyncadd (%p980_p8), %s274_s20, 4294966784  ;;  %s283_s15 = sand.u32 1, %s960_s21   ;;  %s287_s29 = scalar_lea.vmem [#allocation5], %s587_s17 }
  0x35   : > { %s284_s28 = scalar_lea.sflag [#allocation6], %s283_s15 }
  0x36   : > { %865 = dma.done.wait (%p980_p8), %s284_s28, 640  }
  0x37   : > { %867 = vsyncadd (%p980_p8), %s284_s28, 4294966656  ;;  %s1054_s30 = sshll.u32 %s1040_s1, 3  ;;  %s598_s5 = sshll.u32 %s890_s18, 3  ;;  %v341_v0 = vld [vmem:[%s277_s23] sm:$0xff]  ;;  %v342_v1 = vld [vmem:[%s277_s23 + $0x8] sm:$0xff] }
  0x38   : > { %s403_s25 = scalar_lea.hbm %s1124_s4, %s598_s5  ;;  %v592_v2 = vld [vmem:[%s277_s23 + $0x10] sm:$0xff]  ;;  %v593_v3 = vld [vmem:[%s277_s23 + $0x18] sm:$0xff]  ;;  %v346_v4 = vld [vmem:[%s287_s29] sm:$0xff]  ;;  %s337_s21 = scalar_lea.vmem [#allocation9], %s1054_s30 }
  0x39   : > { %v347_v5 = vld [vmem:[%s287_s29 + $0x8] sm:$0xff]  ;;  %s1061_s27 = sshll.u32 %s337_s21, 4  ;;  %v594_v6 = vld [vmem:[%s287_s29 + $0x10] sm:$0xff]  ;;  %v595_v7 = vld [vmem:[%s287_s29 + $0x18] sm:$0xff]  ;;  %s297_s26 = scalar_lea.vmem [#allocation7], %s1054_s30  ;;  %v355_v9 = vsub.f32 %v341_v0, %v346_v4  ;;  %s406_s27 = int_to_ptr.vmem [resolvable:$true] %s1061_s27 }
  0x3a   : > { %v606_v8 = vld [vmem:[%s297_s26] sm:$0xff]   ;;  %v356_v10 = vsub.f32 %v342_v1, %v347_v5  ;;  %s407_s18 = sshll.u32 %s403_s25, 4  ;;  %v359_v13 = vsub.f32 %v592_v2, %v594_v6  ;;  %v360_v14 = vsub.f32 %v593_v3, %v595_v7  ;;  %s1068_s14 = scalar_lea.hbm %s1123_s3, %s598_s5  ;;  %s408_s18 = int_to_ptr.hbm [resolvable:$true] %s407_s18 }
  0x3b   : > { %v607_v11 = vunpack.c.l.bf16 %v606_v8  ;;  %v608_v12 = vunpack.c.h.bf16 %v606_v8  ;;  %v357_v15 = vand.u32 2147483647, %v355_v9  ;;  %s330_s13 = scalar_lea.vmem [#allocation8], %s1054_s30  ;;  %s392_s11 = sshll.u32 %s1068_s14, 4  ;;  %s393_s11 = int_to_ptr.hbm [resolvable:$true] %s392_s11 }
  0x3c   : > { %v358_v16 = vand.u32 2147483647, %v356_v10  ;;  %v361_v17 = vand.u32 2147483647, %v359_v13  ;;  %v362_v18 = vand.u32 2147483647, %v360_v14 }
  0x3d   : > { %v369_v19 = vadd.f32 %v608_v12, %v607_v11  ;;  %s1071_s22 = sshll.u32 %s330_s13, 4  ;;  %s377_s6 = scalar_lea.sflag [#allocation10], %s1040_s1  ;;  %s391_s22 = int_to_ptr.vmem [resolvable:$true] %s1071_s22 }
  0x3e   : > { %v363_v20 = vadd.f32 %v361_v17, %v357_v15  ;;  %v364_v21 = vadd.f32 %v362_v18, %v358_v16  ;;  %s794_s7 = sshra.s32 %s408_s18, 4  ;;  %s800_s15 = scalar_lea.hbm %s1124_s4, 16  ;;  %s795_s7 = int_to_ptr.hbm [resolvable:$true] %s794_s7 }
  0x3f   : > { %370 = vst [vmem:[%s337_s21] sm:$0xff] %v369_v19  ;;  %s796_s17 = scalar_lea.hbm %s795_s7, 8  ;;  %p801_p7 = scmp.lt.s32.totalorder %s795_s7, %s1124_s4 }
  0x40   : > { %p797_p4 = scmp.ne.s32.totalorder %s795_s7, %s796_s17  ;;  %p802_p8 = scmp.lt.s32.totalorder %s800_s15, %s796_s17 }
  0x42   : > { %p798_p5 = pnand %p797_p4, %p984_p9  ;;  %p803_p10 = por %p802_p8, %p801_p7 }
  0x44   : > { %p799_p6 = pneg %p798_p5 }
  0x46   : > { %p804_p13 = pnand %p803_p10, %p799_p6 }
  0x48   : > { %807 = shalt.err (!%p804_p13)
}
  0x49   : > { %616 = dma.vmem_to_hbm [thread:$0]  (%p984_p9), %s406_s27, 128, %s408_s18, %s377_s6   ;;  %v365_v22 = vmul.f32 %v607_v11, %v363_v20  ;;  %v366_v23 = vmul.f32 %v608_v12, %v364_v21 }
  0x4a   : > { %s372_s30 = scalar_lea.sflag [#allocation4], %s1040_s1  ;;  %s822_s5 = sshra.s32 %s393_s11, 4  ;;  %s823_s5 = int_to_ptr.hbm [resolvable:$true] %s822_s5 }
  0x4b   : > { %v367_v24 = vadd.f32 %v366_v23, %v365_v22  ;;  %s824_s8 = scalar_lea.hbm %s823_s5, 8  ;;  %s828_s21 = scalar_lea.hbm %s1123_s3, 16 }
  0x4c   : > { %p825_p0 = scmp.ne.s32.totalorder %s823_s5, %s824_s8  ;;  %p829_p3 = scmp.lt.s32.totalorder %s823_s5, %s1123_s3 }
  0x4d   : > { %368 = vst [vmem:[%s330_s13] sm:$0xff] %v367_v24  ;;  %p830_p4 = scmp.lt.s32.totalorder %s828_s21, %s824_s8 }
  0x4e   : > { %p826_p1 = pnand %p825_p0, %p984_p9 }
  0x4f   : > { %p831_p5 = por %p830_p4, %p829_p3 }
  0x50   : > { %p827_p2 = pneg %p826_p1 }
  0x52   : > { %p832_p6 = pnand %p831_p5, %p827_p2 }
  0x54   : > { %835 = shalt.err (!%p832_p6)
}
  0x55   : > { %615 = dma.vmem_to_hbm [thread:$0]  (%p984_p9), %s391_s22, 128, %s393_s11, %s372_s30  }
  0x56 PF: > { %s1149_s1 = sld [smem:[#allocation15_spill]]  ;;  %p630_p7 = pnand %p576_p12, %p991_p11 }
  0x57   : > { %s1151_s10 = sld [smem:[#allocation17_spill]] }
  0x58   : > { %p631_p8 = pneg %p630_p7 }
  0x5c   : > { %s419_s12 = sand.u32 1, %s1149_s1  }
  0x5d   : > { %s420_s14 = scalar_lea.sflag [#allocation4], %s419_s12 }
  0x5e   : > { %869 = dma.done.wait (%p631_p8), %s420_s14, 128  }
  0x5f   : > { %871 = vsyncadd (%p631_p8), %s420_s14, 4294967168  ;;  %s430_s13 = scalar_lea.sflag [#allocation10], %s419_s12 }
  0x60   : > { %873 = dma.done.wait (%p631_p8), %s430_s13, 128  }
  0x61   : > { %875 = vsyncadd (%p631_p8), %s430_s13, 4294967168  ;;  %s27_s20 = sadd.s32 1, %s1151_s10   ;;  %s1152_s9 = sld [smem:[#allocation16_spill]] }
  0x62   : > { %p24_p10 = scmp.ge.s32.totalorder %s27_s20, 4   ;;  %s1153_s17 = sld [smem:[#allocation20_spill]] }
  0x63   : > { %s1154_s22 = sld [smem:[#allocation18_spill]]  ;;  %s1155_s15 = smov %s882_s16 }
  0x64   : > { %s1157_s18 = smov %s894_s19 }
  0x65   :  { %26 = sbr.rel (!%p24_p10) target bundleno = 12 (0xc), region = 120 }
  0x67   : > { %s1156_s16 = smov %s1152_s9 }
  0x69   : > { %s1158_s19 = smov %s1154_s22 }
  0x6a   :  { %436 = vsyncpa [#allocation3], 1 }
  0x6b   :  { %438 = vsyncpa [#allocation3 + $0x1], 1 }
  0x6c   :  { %439 = vsyncpa [#allocation6], 1 }
  0x6d   :  { %441 = vsyncpa [#allocation6 + $0x1], 1 }
  0x6e   :  { %442 = vsyncpa [#allocation4], 1 }
  0x6f   :  { %444 = vsyncpa [#allocation4 + $0x1], 1 }
  0x70   :  { %445 = vsyncpa [#allocation10], 1 }
  0x71   :  { %447 = vsyncpa [#allocation10 + $0x1], 1 }

</bundles_post_ra>
